<compile_context>
chip_gen: v7x
topology: tpu7x:2x2x1
jax: 0.10.0
libtpu: 0.0.40
codegen_flags: <defaults>
</compile_context>

<pallas_src>
import functools

import jax
import jax.numpy as jnp
from jax.experimental import pallas as pl
from jax.experimental.pallas import tpu as pltpu


# ---------------------------------------------------------------------------
# Kernels
# ---------------------------------------------------------------------------
def _sum_reduce_kernel(x_ref, o_ref, *, rows, tile_r, square, final_sqrt,
                       final_scale):
    """Tiled sum / sum-of-squares reduction with scalar finalize."""
    i = pl.program_id(0)

    @pl.when(i == 0)
    def _init():
        o_ref[0, 0] = jnp.float32(0.0)

    x = x_ref[...].astype(jnp.float32)
    if square:
        x = x * x
    if rows % tile_r != 0:
        # Mask garbage rows of the (out-of-bounds) partial last tile.
        r = i * tile_r + jax.lax.broadcasted_iota(jnp.int32, x.shape, 0)
        x = jnp.where(r < rows, x, 0.0)
    o_ref[0, 0] += jnp.sum(x)

    @pl.when(i == pl.num_programs(0) - 1)
    def _finalize():
        acc = o_ref[0, 0]
        if final_sqrt:
            acc = jnp.sqrt(acc)
        o_ref[0, 0] = acc * jnp.float32(final_scale)


def _argmax_over_channels(x, num_classes):
    """x: (C, T) f32 -> (1, T) int32 argmax over axis 0, first occurrence.

    Unrolled running (max, argmax) compare chain: pure VALU work on lane-dense
    data, no XLU reductions and no [C, T] iota vregs.
    """
    best_v = x[0:1, :]
    best_i = jnp.zeros(best_v.shape, dtype=jnp.int32)
    for cc in range(1, num_classes):
        v = x[cc:cc + 1, :]
        gt = v > best_v          # strict '>' keeps the first maximal index
        best_v = jnp.where(gt, v, best_v)
        best_i = jnp.where(gt, jnp.int32(cc), best_i)
    return best_i


def _flip_kernel(p_ref, pr_ref, o_ref, *, num_classes, hw, tile_hw, scale):
    """flip_mask = (argmax_C(pred) != argmax_C(pred_r)); accumulate sum."""
    ni = pl.program_id(0)
    j = pl.program_id(1)

    @pl.when((ni == 0) & (j == 0))
    def _init():
        o_ref[0, 0] = jnp.float32(0.0)

    a = _argmax_over_channels(p_ref[...].astype(jnp.float32), num_classes)
    b = _argmax_over_channels(pr_ref[...].astype(jnp.float32), num_classes)
    flips = (a != b).astype(jnp.float32)           # (1, tile_hw)

    if hw % tile_hw != 0:
        col = j * tile_hw + jax.lax.broadcasted_iota(jnp.int32, flips.shape, 1)
        flips = jnp.where(col < hw, flips, 0.0)

    o_ref[0, 0] += jnp.sum(flips)

    @pl.when((ni == pl.num_programs(0) - 1) & (j == pl.num_programs(1) - 1))
    def _finalize():
        o_ref[0, 0] = o_ref[0, 0] * jnp.float32(scale)


# ---------------------------------------------------------------------------
# pallas_call wrappers
# ---------------------------------------------------------------------------
# Per-input-tile VMEM budget (bytes).  With 2 pipeline buffers per input this
# stays far below the scoped-VMEM defaults on every generation
# (16 MiB v5e / 32 MiB v6e / 32-of-64 MiB v7x).
_UMAP_TILE_BUDGET = 2 * 1024 * 1024
_FLIP_MAX_TILE_HW = 32768


def _umap_reduce(umap, *, square, final_sqrt, final_scale):
    n, c, h, w = umap.shape
    rows, lanes = n * c, h * w
    x2d = umap.reshape(rows, lanes)          # lane-dense, metadata-only reshape

    row_bytes = lanes * jnp.dtype(umap.dtype).itemsize
    budget_rows = max(1, _UMAP_TILE_BUDGET // row_bytes)
    if budget_rows >= rows:
        tile_r = rows                        # single block == full dim (legal)
    else:
        tile_r = max(8, (budget_rows // 8) * 8)   # sublane-aligned row tiles

    grid = (pl.cdiv(rows, tile_r),)
    kernel = functools.partial(
        _sum_reduce_kernel, rows=rows, tile_r=tile_r, square=square,
        final_sqrt=final_sqrt, final_scale=final_scale)

    out = pl.pallas_call(
        kernel,
        out_shape=jax.ShapeDtypeStruct((1, 1), jnp.float32),
        grid=grid,
        in_specs=[pl.BlockSpec((tile_r, lanes), lambda i: (i, 0))],
        out_specs=pl.BlockSpec(memory_space=pltpu.MemorySpace.SMEM),
        compiler_params=pltpu.CompilerParams(
            dimension_semantics=("arbitrary",)),
    )(x2d)
    return out[0, 0]


def _flip_reduce(pred, pred_r, *, scale):
    n, c, h, w = pred.shape
    hw = h * w
    # Keep NCHW; only a metadata reshape to [N, C, H*W] (H*W is lane-dense).
    p3 = pred.reshape(n, c, hw)
    pr3 = pred_r.reshape(n, c, hw)

    if hw <= _FLIP_MAX_TILE_HW:
        tile_hw = hw                         # block == full dim (legal)
    else:
        tile_hw = (_FLIP_MAX_TILE_HW // 128) * 128

    grid = (n, pl.cdiv(hw, tile_hw))
    kernel = functools.partial(
        _flip_kernel, num_classes=c, hw=hw, tile_hw=tile_hw, scale=scale)

    spec = pl.BlockSpec((pl.Squeezed(), c, tile_hw), lambda ni, j: (ni, 0, j))
    out = pl.pallas_call(
        kernel,
        out_shape=jax.ShapeDtypeStruct((1, 1), jnp.float32),
        grid=grid,
        in_specs=[spec, spec],
        out_specs=pl.BlockSpec(memory_space=pltpu.MemorySpace.SMEM),
        compiler_params=pltpu.CompilerParams(
            dimension_semantics=("arbitrary", "arbitrary")),
    )(p3, pr3)
    return out[0, 0]


class UMapScorePerSlice:
    """JAX/Pallas port of the PyTorch UMapScorePerSlice module."""

    def __init__(self, reduction: str):
        self.r = reduction
        self.dim = (1, 2, 3)  # parity with the torch module (unused)

    def __call__(self, umap=None, pred=None, pred_r=None):
        if self.r == "mean":
            assert umap is not None
            return _umap_reduce(umap, square=False, final_sqrt=False,
                                final_scale=1.0 / float(umap.size))
        elif self.r == "norm":
            assert umap is not None
            return _umap_reduce(umap, square=True, final_sqrt=True,
                                final_scale=1.0)
        elif self.r in ("nflips", "nNflips"):
            assert pred is not None and pred_r is not None
            n, c, h, w = pred.shape
            scale = 1.0 if self.r == "nflips" else 1.0 / float(n * h * w)
            return _flip_reduce(pred, pred_r, scale=scale)
        else:
            raise ValueError(f"unknown reduction {self.r}")


# ---------------------------------------------------------------------------
# Demo / self-check
# ---------------------------------------------------------------------------
if __name__ == "__main__":
    key = jax.random.PRNGKey(0)
    k1, k2, k3 = jax.random.split(key, 3)

    N, C, H, W = 2, 4, 16, 16
    umap = jax.random.normal(k1, (N, C, H, W), dtype=jnp.float32)
    pred = jax.random.normal(k2, (N, C, H, W), dtype=jnp.float32)
    pred_r = jax.random.normal(k3, (N, C, H, W), dtype=jnp.float32)

    results = {}
    results["mean"] = UMapScorePerSlice("mean")(umap=umap)
    results["norm"] = UMapScorePerSlice("norm")(umap=umap)
    results["nflips"] = UMapScorePerSlice("nflips")(pred=pred, pred_r=pred_r)
    results["nNflips"] = UMapScorePerSlice("nNflips")(pred=pred, pred_r=pred_r)

    for v in results.values():
        jax.block_until_ready(v)

    # reference check in plain JAX (mirrors the torch semantics)
    ref_mean = jnp.mean(umap)
    ref_norm = jnp.sqrt(jnp.sum(umap * umap))
    flips = (jnp.argmax(pred, axis=1) != jnp.argmax(pred_r, axis=1)).astype(jnp.float32)
    ref_nflips = jnp.sum(flips)
    ref_nNflips = jnp.mean(flips)

    assert jnp.allclose(results["mean"], ref_mean, atol=1e-5)
    assert jnp.allclose(results["norm"], ref_norm, atol=1e-4)
    assert jnp.allclose(results["nflips"], ref_nflips, atol=1e-5)
    assert jnp.allclose(results["nNflips"], ref_nNflips, atol=1e-6)

    print("KERNEL_OK")
</pallas_src>

<mosaic_0001>
module attributes {stable_mosaic.version = 11 : i64} {
  func.func @_sum_reduce_kernel(%arg0: i32, %arg1: memref<8x256xf32, #tpu.memory_space<vmem>>, %arg2: memref<1x1xf32, #tpu.memory_space<smem>>) attributes {dimension_semantics = [#tpu.dimension_semantics<arbitrary>], iteration_bounds = array<i64: 1>, scalar_prefetch = 0 : i64, scratch_operands = 0 : i64, tpu.core_type = #tpu.core_type<tc>, window_params = [{transform_indices = @transform_0, window_bounds = array<i64: 8, 256>}, {transform_indices = @transform_1, window_bounds = array<i64: 1, 1>}]} {
    %c0_i32 = arith.constant 0 : i32
    %0 = arith.cmpi eq, %arg0, %c0_i32 : i32
    %1 = arith.extui %0 : i1 to i32
    %c0_i32_0 = arith.constant 0 : i32
    %2 = arith.cmpi ne, %1, %c0_i32_0 : i32
    scf.if %2 {
      %cst_8 = arith.constant 0.000000e+00 : f32
      %c0_9 = arith.constant 0 : index
      %c0_10 = arith.constant 0 : index
      %14 = memref.load %arg2[%c0_9, %c0_10] : memref<1x1xf32, #tpu.memory_space<smem>>
      memref.store %cst_8, %arg2[%c0_9, %c0_10] : memref<1x1xf32, #tpu.memory_space<smem>>
    } else {
    }
    %c0 = arith.constant 0 : index
    %c0_1 = arith.constant 0 : index
    %3 = vector.load %arg1[%c0, %c0_1] : memref<8x256xf32, #tpu.memory_space<vmem>>, vector<8x256xf32>
    %c0_2 = arith.constant 0 : index
    %c0_3 = arith.constant 0 : index
    %4 = memref.load %arg2[%c0_2, %c0_3] : memref<1x1xf32, #tpu.memory_space<smem>>
    %5 = vector.shape_cast %3 : vector<8x256xf32> to vector<1x8x256xf32>
    %cst = arith.constant dense<0.000000e+00> : vector<1xf32>
    %6 = vector.multi_reduction <add>, %5, %cst [1, 2] : vector<1x8x256xf32> to vector<1xf32>
    %7 = vector.shape_cast %6 : vector<1xf32> to vector<1x1x1xf32>
    %8 = vector.extract %7[0, 0, 0] : f32 from vector<1x1x1xf32>
    %9 = arith.addf %4, %8 : f32
    %c0_4 = arith.constant 0 : index
    %c0_5 = arith.constant 0 : index
    %10 = memref.load %arg2[%c0_4, %c0_5] : memref<1x1xf32, #tpu.memory_space<smem>>
    memref.store %9, %arg2[%c0_4, %c0_5] : memref<1x1xf32, #tpu.memory_space<smem>>
    %c0_i32_6 = arith.constant 0 : i32
    %11 = arith.cmpi eq, %arg0, %c0_i32_6 : i32
    %12 = arith.extui %11 : i1 to i32
    %c0_i32_7 = arith.constant 0 : i32
    %13 = arith.cmpi ne, %12, %c0_i32_7 : i32
    scf.if %13 {
      %c0_8 = arith.constant 0 : index
      %c0_9 = arith.constant 0 : index
      %14 = memref.load %arg2[%c0_8, %c0_9] : memref<1x1xf32, #tpu.memory_space<smem>>
      %cst_10 = arith.constant 4.8828125E-4 : f32
      %15 = arith.mulf %14, %cst_10 : f32
      %c0_11 = arith.constant 0 : index
      %c0_12 = arith.constant 0 : index
      %16 = memref.load %arg2[%c0_11, %c0_12] : memref<1x1xf32, #tpu.memory_space<smem>>
      memref.store %15, %arg2[%c0_11, %c0_12] : memref<1x1xf32, #tpu.memory_space<smem>>
    } else {
    }
    return
  }
  func.func @transform_0(%arg0: i32) -> (i32, i32) {
    %c0_i32 = arith.constant 0 : i32
    %c0_i32_0 = arith.constant 0 : i32
    return %arg0, %c0_i32 : i32, i32
  }
  func.func @transform_1(%arg0: i32) -> (i32, i32) {
    %c0_i32 = arith.constant 0 : i32
    %c0_i32_0 = arith.constant 0 : i32
    %c0_i32_1 = arith.constant 0 : i32
    return %c0_i32, %c0_i32_0 : i32, i32
  }
}

</mosaic_0001>

<bundles_post_ra>
// kernel: tpu_custom_call.1
= control target key start
LH: loop header
LB: loop body
LE: loop exit
PB: predicated region body
PF: predicated region fallthrough
CT: control target
= control target key end

     0   :  { %6 = vsyncpa [#allocation3], 0  ;;  %s140_s0 = inlined_call_operand.hbm [shape: f32[8,256], index: 0, kind: input, shape index: {}]   ;;  %s141_s1 = inlined_call_operand.hbm [shape: f32[1,1], index: 1, kind: output, shape index: {}]  }
   0x1   :  { %7 = vsyncpa [#allocation4], 0  ;;  %s104_s6 = smov [#allocation2]   ;;  %s68_s10 = scalar_lea.hbm %s140_s0, 256 }
   0x2   :  { %s14_s7 = sshll.u32 %s104_s6, 4  ;;  %p69_p0 = scmp.ne.s32.totalorder %s140_s0, %s68_s10  ;;  %s15_s7 = int_to_ptr.vmem [resolvable:$true] %s14_s7 }
   0x3   :  { %p72_p1 = scmp.lt.u32.totalorder %s68_s10, %s140_s0 }
   0x5   :  { %p74_p2 = pnand %p72_p1, %p69_p0 }
   0x7   :  { %77 = shalt.err (!%p74_p2)
}
   0x8   :  { %s78_s15 = scalar_lea.vmem %s15_s7, 256  ;;  %p83_p4 = scmp.lt.s32.totalorder %s15_s7, %s15_s7 }
   0x9   :  { %p79_p3 = scmp.ne.s32.totalorder %s15_s7, %s78_s15  ;;  %p84_p5 = scmp.lt.s32.totalorder %s78_s15, %s78_s15 }
   0xb   :  { %p85_p6 = por %p84_p5, %p83_p4 }
   0xd   :  { %p86_p7 = pnand %p85_p6, %p79_p3 }
   0xf   :  { %89 = shalt.err (!%p86_p7)
}
  0x10   :  { %17 = dma.hbm_to_vmem [thread:$0]  %s140_s0, 256, %s15_s7, [#allocation3]  }
  0x11   :  { %100 = dma.done.wait [#allocation3], 256  }
  0x12   :  { %101 = vsyncadd [#allocation3], 4294967040  ;;  %v27_v0 = vld [vmem:[#allocation2] sm:$0xff]  ;;  %v28_v1 = vld [vmem:[#allocation2 + $0x8] sm:$0xff]  ;;  %s90_s0 = scalar_lea.hbm %s141_s1, 16 }
  0x13   :  { %v30_v2 = vadd.f32 %v28_v1, %v27_v0  ;;  %p91_p8 = scmp.ne.s32.totalorder %s141_s1, %s90_s0  ;;  %p94_p9 = scmp.lt.u32.totalorder %s90_s0, %s141_s1 }
  0x15   :  { %31 = vadd.xlane.f32.xlu0 %v30_v2  ;;  %p96_p10 = pnand %p94_p9, %p91_p8 }
  0xa2   :  { %v32_v3 = vpop.xlane.xlu0 %31 }
  0xa3   :  { %v33_v4 = vrot.slane %v32_v3, 4 }
  0xa5   :  { %v34_v5 = vadd.f32 %v33_v4, %v32_v3 }
  0xa7   :  { %v35_v6 = vrot.slane %v34_v5, 2 }
  0xa9   :  { %v36_v7 = vadd.f32 %v35_v6, %v34_v5 }
  0xab   :  { %v37_v8 = vrot.slane %v36_v7, 1 }
  0xad   :  { %v38_v9 = vadd.f32 %v37_v8, %v36_v7 }
  0xaf   :  { %63 = vpush %v38_v9 }
  0xe0   :  { %s64_s18 = spop %63 }
  0xe1   :  { %s47_s19 = smul.f32 0.00048828125, %s64_s18 }
  0xe3   :  { %48 = sst [smem:[#allocation5]] %s47_s19 }
  0xe4   :  { %99 = shalt.err (!%p96_p10)
}
  0xe5   :  { %s105_s26 = smov [#allocation5]  }
  0xe6   :  { %56 = dma.smem_to_hbm %s105_s26, 16, %s141_s1, [#allocation4]  }
  0xe7   :  { %102 = dma.done.wait [#allocation4], 16  }
  0xe8   :  { %103 = vsyncadd [#allocation4], 4294967280 }
  0xe9   :  { %60 = sfence }
  0xea   :  { %61 = vsyncpa [#allocation3], 1 }
  0xeb   :  { %62 = vsyncpa [#allocation4], 1 }

</bundles_post_ra>
